<compile_context>
chip_gen: v7x
topology: tpu7x:2x2x1
jax: 0.10.0
libtpu: 0.0.40
codegen_flags: <defaults>
</compile_context>

<pallas_src>
import jax
import jax.numpy as jnp
import numpy as np
from jax import lax
from jax.experimental import pallas as pl
from jax.experimental.pallas import tpu as pltpu


def _iwt_kernel(x_ref, o_ref):
    # x_ref: (1, 4, TM, W) f32     o_ref: (1, TM, 4W) f32
    W = x_ref.shape[-1]

    x1 = x_ref[0, 0]
    x2 = x_ref[0, 1]
    x3 = x_ref[0, 2]
    x4 = x_ref[0, 3]

    # Signed Haar combinations on the VPU (exact f32; *0.5 is exact).
    a = (x1 - x2 - x3 + x4) * 0.5   # -> output rows 2h,   cols 2w
    b = (x1 - x2 + x3 - x4) * 0.5   # -> output rows 2h+1, cols 2w
    c = (x1 + x2 - x3 - x4) * 0.5   # -> output rows 2h,   cols 2w+1
    d = (x1 + x2 + x3 + x4) * 0.5   # -> output rows 2h+1, cols 2w+1

    # 0/1 spread matrices built from iotas: E[w, 2w] = 1, O[w, 2w+1] = 1.
    w_idx = lax.broadcasted_iota(jnp.int32, (W, 2 * W), 0)
    j_idx = lax.broadcasted_iota(jnp.int32, (W, 2 * W), 1)
    E = (j_idx == 2 * w_idx).astype(jnp.float32)
    O = (j_idx == 2 * w_idx + 1).astype(jnp.float32)

    # Even/odd column interleave on the MXU.  Matrices are 0/1, so with the
    # data operand kept at full precision the result is the exact f32 value.
    hi = lax.Precision.HIGHEST
    row_even = (jnp.dot(a, E, precision=hi, preferred_element_type=jnp.float32)
                + jnp.dot(c, O, precision=hi, preferred_element_type=jnp.float32))
    row_odd = (jnp.dot(b, E, precision=hi, preferred_element_type=jnp.float32)
               + jnp.dot(d, O, precision=hi, preferred_element_type=jnp.float32))

    # Output block row m = [even output row (2W) | odd output row (2W)].
    o_ref[0, :, 0:2 * W] = row_even
    o_ref[0, :, 2 * W:4 * W] = row_odd


def _pick_row_tile(M: int, W: int, B: int) -> int:
    """Row tile: multiple of 8 (or the full extent), sized from a VMEM budget."""
    if M <= 8:
        return M
    # Double-buffered input (4*TM*W f32) + output (TM*4W f32) blocks
    # -> 64*W bytes per row in flight; aim for ~16 MiB of pipelined blocks.
    budget_rows = (16 * 1024 * 1024) // (64 * max(W, 1))
    tm = min(budget_rows, 2048, M)
    if tm >= M:
        tm = M
        if B == 1:
            # Keep >= 2 grid steps so both v7x TensorCores get work.
            half = -(-M // 2)
            tm = min(M, -(-half // 8) * 8)
    else:
        tm = max(8, (tm // 8) * 8)
    return tm


def _vmem_limit_bytes(tm: int, W: int) -> int:
    f32 = 4
    blocks = 2 * (4 * tm * W * f32) + 2 * (tm * 4 * W * f32)      # in + out, double-buffered
    temps = 8 * tm * W * f32 + 4 * tm * 2 * W * f32 + 4 * W * 2 * W * f32
    total = blocks + temps + (4 << 20)                            # slack for spills
    return int(min(max(total, 32 << 20), 64 << 20))


@jax.jit
def iwt_pallas(x):
    """Inverse wavelet transform.  x: (B, 4C, H, W) -> (B, C, 2H, 2W) float32."""
    B, C4, H, W = x.shape
    assert C4 % 4 == 0, "input channel count must be divisible by 4"
    C = C4 // 4
    M = C * H

    # (B, 4C, H, W) -> (B, 4, C*H, W): contiguous row-major reshape, free.
    xr = x.astype(jnp.float32).reshape(B, 4, M, W)

    TM = _pick_row_tile(M, W, B)
    grid = (B, pl.cdiv(M, TM))

    flops = 16 * B * M * W * W + 12 * B * M * W      # 4 spread matmuls + VPU combos
    bytes_accessed = 32 * B * M * W                  # read N f32 + write N f32

    out_flat = pl.pallas_call(
        _iwt_kernel,
        out_shape=jax.ShapeDtypeStruct((B, M, 4 * W), jnp.float32),
        grid=grid,
        in_specs=[pl.BlockSpec((1, 4, TM, W), lambda b, m: (b, 0, m, 0))],
        out_specs=pl.BlockSpec((1, TM, 4 * W), lambda b, m: (b, m, 0)),
        compiler_params=pltpu.CompilerParams(
            dimension_semantics=("parallel", "parallel"),
            vmem_limit_bytes=_vmem_limit_bytes(TM, W)),
        cost_estimate=pl.CostEstimate(flops=flops, transcendentals=0,
                                      bytes_accessed=bytes_accessed),
    )(xr)

    # (B, C*H, 4W) -> (B, C, 2H, 2W): contiguous reshape (row parity and column
    # parity are already laid out in the right order), free.
    return out_flat.reshape(B, C, 2 * H, 2 * W)


# ----------------------- pure-JAX reference ---------------------------------
def iwt_ref(x):
    B, C4, H, W = x.shape
    C = C4 // 4
    x1 = x[:, 0 * C:1 * C] / 2
    x2 = x[:, 1 * C:2 * C] / 2
    x3 = x[:, 2 * C:3 * C] / 2
    x4 = x[:, 3 * C:4 * C] / 2
    h = jnp.zeros((B, C, 2 * H, 2 * W), jnp.float32)
    h = h.at[:, :, 0::2, 0::2].set(x1 - x2 - x3 + x4)
    h = h.at[:, :, 1::2, 0::2].set(x1 - x2 + x3 - x4)
    h = h.at[:, :, 0::2, 1::2].set(x1 + x2 - x3 - x4)
    h = h.at[:, :, 1::2, 1::2].set(x1 + x2 + x3 + x4)
    return h


# ------------------------------ main -----------------------------------------
if __name__ == "__main__":
    B, C4, H, W = 2, 16, 16, 16          # output: (2, 4, 32, 32)
    key = jax.random.PRNGKey(0)
    x = jax.random.normal(key, (B, C4, H, W), jnp.float32)

    out = jax.block_until_ready(iwt_pallas(x))
    ref = jax.block_until_ready(iwt_ref(x))

    np.testing.assert_allclose(np.asarray(out), np.asarray(ref),
                               rtol=1e-5, atol=1e-5)
    print("KERNEL_OK")
</pallas_src>

<mosaic_0001>
module attributes {stable_mosaic.version = 11 : i64} {
  func.func @_iwt_kernel(%arg0: i32, %arg1: i32, %arg2: memref<1x4x64x16xf32, #tpu.memory_space<vmem>>, %arg3: memref<1x64x64xf32, #tpu.memory_space<vmem>>) attributes {dimension_semantics = [#tpu.dimension_semantics<parallel>, #tpu.dimension_semantics<parallel>], iteration_bounds = array<i64: 2, 1>, scalar_prefetch = 0 : i64, scratch_operands = 0 : i64, tpu.core_type = #tpu.core_type<tc>, window_params = [{transform_indices = @transform_0, window_bounds = array<i64: 1, 4, 64, 16>}, {transform_indices = @transform_1, window_bounds = array<i64: 1, 64, 64>}]} {
    %c0 = arith.constant 0 : index
    %c0_0 = arith.constant 0 : index
    %c0_1 = arith.constant 0 : index
    %c0_2 = arith.constant 0 : index
    %0 = vector.load %arg2[%c0, %c0_0, %c0_1, %c0_2] : memref<1x4x64x16xf32, #tpu.memory_space<vmem>>, vector<1x1x64x16xf32>
    %1 = vector.shape_cast %0 : vector<1x1x64x16xf32> to vector<64x16xf32>
    %c0_3 = arith.constant 0 : index
    %c1 = arith.constant 1 : index
    %c0_4 = arith.constant 0 : index
    %c0_5 = arith.constant 0 : index
    %2 = vector.load %arg2[%c0_3, %c1, %c0_4, %c0_5] : memref<1x4x64x16xf32, #tpu.memory_space<vmem>>, vector<1x1x64x16xf32>
    %3 = vector.shape_cast %2 : vector<1x1x64x16xf32> to vector<64x16xf32>
    %c0_6 = arith.constant 0 : index
    %c2 = arith.constant 2 : index
    %c0_7 = arith.constant 0 : index
    %c0_8 = arith.constant 0 : index
    %4 = vector.load %arg2[%c0_6, %c2, %c0_7, %c0_8] : memref<1x4x64x16xf32, #tpu.memory_space<vmem>>, vector<1x1x64x16xf32>
    %5 = vector.shape_cast %4 : vector<1x1x64x16xf32> to vector<64x16xf32>
    %c0_9 = arith.constant 0 : index
    %c3 = arith.constant 3 : index
    %c0_10 = arith.constant 0 : index
    %c0_11 = arith.constant 0 : index
    %6 = vector.load %arg2[%c0_9, %c3, %c0_10, %c0_11] : memref<1x4x64x16xf32, #tpu.memory_space<vmem>>, vector<1x1x64x16xf32>
    %7 = vector.shape_cast %6 : vector<1x1x64x16xf32> to vector<64x16xf32>
    %8 = arith.subf %1, %3 : vector<64x16xf32>
    %9 = arith.subf %8, %5 : vector<64x16xf32>
    %10 = arith.addf %9, %7 : vector<64x16xf32>
    %cst = arith.constant 5.000000e-01 : f32
    %11 = vector.broadcast %cst : f32 to vector<64x16xf32>
    %12 = arith.mulf %10, %11 : vector<64x16xf32>
    %13 = arith.subf %1, %3 : vector<64x16xf32>
    %14 = arith.addf %13, %5 : vector<64x16xf32>
    %15 = arith.subf %14, %7 : vector<64x16xf32>
    %cst_12 = arith.constant 5.000000e-01 : f32
    %16 = vector.broadcast %cst_12 : f32 to vector<64x16xf32>
    %17 = arith.mulf %15, %16 : vector<64x16xf32>
    %18 = arith.addf %1, %3 : vector<64x16xf32>
    %19 = arith.subf %18, %5 : vector<64x16xf32>
    %20 = arith.subf %19, %7 : vector<64x16xf32>
    %cst_13 = arith.constant 5.000000e-01 : f32
    %21 = vector.broadcast %cst_13 : f32 to vector<64x16xf32>
    %22 = arith.mulf %20, %21 : vector<64x16xf32>
    %23 = arith.addf %1, %3 : vector<64x16xf32>
    %24 = arith.addf %23, %5 : vector<64x16xf32>
    %25 = arith.addf %24, %7 : vector<64x16xf32>
    %cst_14 = arith.constant 5.000000e-01 : f32
    %26 = vector.broadcast %cst_14 : f32 to vector<64x16xf32>
    %27 = arith.mulf %25, %26 : vector<64x16xf32>
    %28 = tpu.iota {dimensions = array<i32: 0>} : vector<16x32xi32>
    %29 = tpu.iota {dimensions = array<i32: 1>} : vector<16x32xi32>
    %c2_i32 = arith.constant 2 : i32
    %30 = vector.broadcast %c2_i32 : i32 to vector<16x32xi32>
    %31 = arith.muli %30, %28 : vector<16x32xi32>
    %32 = arith.cmpi eq, %29, %31 : vector<16x32xi32>
    %33 = arith.extui %32 : vector<16x32xi1> to vector<16x32xi32>
    %34 = arith.sitofp %33 : vector<16x32xi32> to vector<16x32xf32>
    %c2_i32_15 = arith.constant 2 : i32
    %35 = vector.broadcast %c2_i32_15 : i32 to vector<16x32xi32>
    %36 = arith.muli %35, %28 : vector<16x32xi32>
    %c1_i32 = arith.constant 1 : i32
    %37 = vector.broadcast %c1_i32 : i32 to vector<16x32xi32>
    %38 = arith.addi %36, %37 : vector<16x32xi32>
    %39 = arith.cmpi eq, %29, %38 : vector<16x32xi32>
    %40 = arith.extui %39 : vector<16x32xi1> to vector<16x32xi32>
    %41 = arith.sitofp %40 : vector<16x32xi32> to vector<16x32xf32>
    %cst_16 = arith.constant dense<0.000000e+00> : vector<64x32xf32>
    %42 = tpu.matmul %12, %34, %cst_16 {dimension_numbers = #tpu.dot_dimension_numbers<[1], [0], [0], [1], [0, 0, 1, 1], [], []>, precision = #tpu.contract_precision<fp32>} : vector<64x16xf32>, vector<16x32xf32>, vector<64x32xf32> -> vector<64x32xf32>
    %cst_17 = arith.constant dense<0.000000e+00> : vector<64x32xf32>
    %43 = tpu.matmul %22, %41, %cst_17 {dimension_numbers = #tpu.dot_dimension_numbers<[1], [0], [0], [1], [0, 0, 1, 1], [], []>, precision = #tpu.contract_precision<fp32>} : vector<64x16xf32>, vector<16x32xf32>, vector<64x32xf32> -> vector<64x32xf32>
    %44 = arith.addf %42, %43 : vector<64x32xf32>
    %cst_18 = arith.constant dense<0.000000e+00> : vector<64x32xf32>
    %45 = tpu.matmul %17, %34, %cst_18 {dimension_numbers = #tpu.dot_dimension_numbers<[1], [0], [0], [1], [0, 0, 1, 1], [], []>, precision = #tpu.contract_precision<fp32>} : vector<64x16xf32>, vector<16x32xf32>, vector<64x32xf32> -> vector<64x32xf32>
    %cst_19 = arith.constant dense<0.000000e+00> : vector<64x32xf32>
    %46 = tpu.matmul %27, %41, %cst_19 {dimension_numbers = #tpu.dot_dimension_numbers<[1], [0], [0], [1], [0, 0, 1, 1], [], []>, precision = #tpu.contract_precision<fp32>} : vector<64x16xf32>, vector<16x32xf32>, vector<64x32xf32> -> vector<64x32xf32>
    %47 = arith.addf %45, %46 : vector<64x32xf32>
    %c0_20 = arith.constant 0 : index
    %c0_21 = arith.constant 0 : index
    %c0_22 = arith.constant 0 : index
    %48 = vector.load %arg3[%c0_20, %c0_21, %c0_22] : memref<1x64x64xf32, #tpu.memory_space<vmem>>, vector<1x64x32xf32>
    %49 = vector.shape_cast %48 : vector<1x64x32xf32> to vector<64x32xf32>
    %50 = vector.shape_cast %44 : vector<64x32xf32> to vector<1x64x32xf32>
    tpu.vector_store %arg3[%c0_20, %c0_21, %c0_22], %50 {strides = array<i32>} : memref<1x64x64xf32, #tpu.memory_space<vmem>>, vector<1x64x32xf32>,
    %c0_23 = arith.constant 0 : index
    %c0_24 = arith.constant 0 : index
    %c32 = arith.constant 32 : index
    %51 = vector.load %arg3[%c0_23, %c0_24, %c32] : memref<1x64x64xf32, #tpu.memory_space<vmem>>, vector<1x64x32xf32>
    %52 = vector.shape_cast %51 : vector<1x64x32xf32> to vector<64x32xf32>
    %53 = vector.shape_cast %47 : vector<64x32xf32> to vector<1x64x32xf32>
    tpu.vector_store %arg3[%c0_23, %c0_24, %c32], %53 {strides = array<i32>} : memref<1x64x64xf32, #tpu.memory_space<vmem>>, vector<1x64x32xf32>,
    return
  }
  func.func @transform_0(%arg0: i32, %arg1: i32) -> (i32, i32, i32, i32) {
    %c0_i32 = arith.constant 0 : i32
    %c0_i32_0 = arith.constant 0 : i32
    %c0_i32_1 = arith.constant 0 : i32
    return %arg0, %c0_i32, %arg1, %c0_i32_0 : i32, i32, i32, i32
  }
  func.func @transform_1(%arg0: i32, %arg1: i32) -> (i32, i32, i32) {
    %c0_i32 = arith.constant 0 : i32
    %c0_i32_0 = arith.constant 0 : i32
    return %arg0, %arg1, %c0_i32 : i32, i32, i32
  }
}

</mosaic_0001>

<bundles_post_ra>
// kernel: iwt_pallas.1
= control target key start
LH: loop header
LB: loop body
LE: loop exit
PB: predicated region body
PF: predicated region fallthrough
CT: control target
= control target key end

     0   :  { %6 = vsyncpa [#allocation3], 0  ;;  %s5842_s0 = inlined_call_operand.hbm [shape: f32[2,4,64,16], index: 0, kind: input, shape index: {}]   ;;  %s5843_s1 = inlined_call_operand.vmem [shape: f32[2,64,64], index: 1, kind: output, shape index: {}]  }
   0x1   :  { %8 = vsyncpa [#allocation3 + $0x1], 0  ;;  %s4736_s6 = smov 0   ;;  %s4738_s7 = smov 0  }
   0x2   :  { %s4740_s8 = smov 0   ;;  %s4742_s9 = smov 0  }
   0x3   :  { %s4744_s10 = smov 0   ;;  %s4746_s11 = smov 0  }
   0x4 LB: > { %s3615_s12 = sadd.s32 4294967295, %s4718_s11   ;;  %s26_s13 = sadd.s32 1, %s4714_s10  ;;  %s4718_s11 = sphi %s4746_s11, %s14_s11   ;;  %s4714_s10 = sphi %s4744_s10, %s5999_s10   ;;  %s4710_s9 = sphi %s4742_s9, %s5998_s9   ;;  %s4706_s8 = sphi %s4740_s8, %s5997_s8   ;;  %s4702_s7 = sphi %s4738_s7, %s5996_s7   ;;  %s4698_s6 = sphi %s4736_s6, %s5995_s6  }
   0x5   : > { %p28_p0 = scmp.ge.s32.totalorder %s26_s13, 2  ;;  %s35_s14 = sadd.s32 1, %s4706_s8 }
   0x6   : > { %p42_p1 = scmp.ne.s32.totalorder %s4706_s8, %s4702_s7  ;;  %p43_p2 = scmp.eq.s32.totalorder %s4718_s11, 0 }
   0x7   : > { %s6001_s13 = smov (%p28_p0, %s26_s13), 0  ;;  %p48_p4 = scmp.ne.s32.totalorder %s4702_s7, %s4698_s6 }
   0x8   : > { %p4772_p3 = por %p43_p2, %p42_p1  ;;  %s30_s16 = ssub.s32 %s4714_s10, %s6001_s13 }
   0x9   : > { %p49_p5 = scmp.eq.s32.totalorder %s3615_s12, 0  ;;  %p33_p6 = scmp.eq.s32.totalorder %s30_s16, 0 }
   0xa   : > { %p4584_p8 = scmp.lt.s32.totalorder %s4718_s11, 2  ;;  %s100_s19 = sand.u32 1, %s4706_s8  }
   0xb   : > { %p4779_p7 = por %p49_p5, %p48_p4  ;;  %s3680_s20 = sshll.u32 %s4714_s10, 12 }
   0xc   : > { %s4785_s18 = scalar_select %p33_p6, %s4706_s8, %s35_s14  }
   0xd   : > { %s3619_s21 = sshll.u32 %s100_s19, 8  ;;  %s4792_s24 = scalar_lea.hbm %s5842_s0, %s3680_s20 }
   0xe   : > { %s104_s25 = scalar_lea.vmem [#allocation2], %s3619_s21  ;;  %p4796_p9 = pnand %p4584_p8, %p4772_p3 }
   0xf   : > { %s113_s26 = sshll.u32 %s104_s25, 4  ;;  %s4802_s28 = scalar_lea.sflag [#allocation3], %s100_s19  ;;  %s4800_s26 = int_to_ptr.vmem [resolvable:$true] %s113_s26 }
  0x10   : > { %s4638_s29 = scalar_lea.hbm %s4792_s24, 4096  ;;  %p4640_p11 = pneg %p4796_p9 }
  0x11   : > { %p4639_p10 = scmp.ne.s32.totalorder %s4792_s24, %s4638_s29  ;;  %s4643_s3 = scalar_lea.hbm %s5842_s0, 8192 }
  0x12   : > { %p4644_p0 = scmp.lt.u32.totalorder %s4792_s24, %s5842_s0  ;;  %p4645_p1 = scmp.lt.u32.totalorder %s4643_s3, %s4638_s29 }
  0x13   : > { %p4641_p12 = pnand %p4640_p11, %p4639_p10  ;;  %p4647_p3 = scmp.lt.u32.totalorder %s4638_s29, %s4792_s24 }
  0x14   : > { %p4646_p2 = por %p4645_p1, %p4644_p0 }
  0x15   : > { %p4642_p13 = pneg %p4641_p12 }
  0x16   : > { %p4648_p4 = por %p4647_p3, %p4646_p2 }
  0x18   : > { %p4649_p5 = pnand %p4648_p4, %p4642_p13 }
  0x1a   : > { %4652 = shalt.err (!%p4649_p5)
}
  0x1b   : > { %s4653_s6 = scalar_lea.vmem %s4800_s26, 4096  ;;  %s4720_s12 = smov [#allocation2]  }
  0x1c   : > { %p4654_p6 = scmp.ne.s32.totalorder %s4800_s26, %s4653_s6  ;;  %s4658_s14 = sshll.u32 %s4720_s12, 4  ;;  %s4659_s14 = int_to_ptr.vmem [resolvable:$false] %s4658_s14 }
  0x1d   : > { %s4660_s15 = scalar_lea.vmem %s4659_s14, 8192  ;;  %p4661_p12 = scmp.lt.s32.totalorder %s4800_s26, %s4659_s14 }
  0x1e   : > { %p4656_p8 = pnand %p4654_p6, %p4640_p11  ;;  %p4662_p0 = scmp.lt.s32.totalorder %s4660_s15, %s4653_s6 }
  0x20   : > { %p4657_p10 = pneg %p4656_p8  ;;  %p4663_p1 = por %p4662_p0, %p4661_p12 }
  0x22   : > { %p4664_p2 = pnand %p4663_p1, %p4657_p10 }
  0x24   : > { %4667 = shalt.err (!%p4664_p2)
}
  0x25   : > { %s4721_s16 = smov 128   ;;  %s4722_s19 = smov 8  }
  0x26   : > { %4583 = dma.hbm_to_vmem [thread:$0]  (!%p4796_p9), %s4792_s24, 4096, %s4800_s26, %s4802_s28, %s4721_s16, %s4721_s16, %s4722_s19  }
  0x27   : > { %p3622_p11 = scmp.ge.s32.totalorder %s4718_s11, 1  ;;  %p121_p13 = scmp.lt.s32.totalorder %s4718_s11, 3 }
  0x29   : > { %p122_p3 = pnand %p3622_p11, %p121_p13 }
  0x2b   : > { %125 = sbr.rel (%p122_p3) target bundleno = 619 (0x26b), region = 24 }
  0x32   : > { %s127_s20 = sand.u32 1, %s4702_s7  }
  0x33   : > { %s3623_s21 = sshll.u32 %s127_s20, 8  ;;  %s128_s22 = scalar_lea.sflag [#allocation3], %s127_s20 }
  0x34   : > { %s4833_s23 = scalar_lea.vmem [#allocation2], %s3623_s21 }
  0x35   : > { %4693 = dma.done.wait (%p4779_p7), %s128_s22, 4096  }
  0x36   : > { %4695 = vsyncadd (%p4779_p7), %s128_s22, 4294963200  ;;  %v312_v0 = vlaneseq  ;;  %v165_v8 = vld [vmem:[%s4833_s23] sm:$0xff]  ;;  %vm333_vm1 = vcmask 130048   ;;  %v166_v14 = vld [vmem:[%s4833_s23 + $0x8] sm:$0xff]  ;;  %v5851_v17 = vmov 0.0   ;;  %v5914_v63 = vmov 0 }
  0x37   : > { %v3626_v9 = vld [vmem:[%s4833_s23 + $0x40] sm:$0xff]  ;;  %v3627_v15 = vld [vmem:[%s4833_s23 + $0x48] sm:$0xff]  ;;  %v4874_v27 = vld [vmem:[%s4833_s23 + $0x10] sm:$0xff]  ;;  %v5849_v34 = vmov 1.0|1.0   ;;  %p156_p7 = scmp.lt.s32.totalorder %s4710_s9, 1 }
  0x38   : > { %v313_v1 = vshrl.u32 %v312_v0, 7  ;;  %v316_v3 = vand.u32 127, %v312_v0  ;;  %v4846_v10 = vld [vmem:[%s4833_s23 + $0x80] sm:$0xff]  ;;  %v4848_v12 = vsub.f32 %v165_v8, %v3626_v9  ;;  %v256_v13 = vadd.f32 %v3626_v9, %v165_v8  ;;  %v4858_v19 = vld [vmem:[%s4833_s23 + $0x88] sm:$0xff]  ;;  %v4877_v28 = vld [vmem:[%s4833_s23 + $0x50] sm:$0xff]  ;;  %s4725_s27 = smov 32  }
  0x39   : > { %v4853_v16 = vld [vmem:[%s4833_s23 + $0xc0] sm:$0xff]  ;;  %v4860_v20 = vsub.f32 %v166_v14, %v3627_v15  ;;  %v257_v21 = vadd.f32 %v3627_v15, %v166_v14  ;;  %v4871_v26 = vld [vmem:[%s4833_s23 + $0xc8] sm:$0xff]  ;;  %v4904_v39 = vld [vmem:[%s4833_s23 + $0x90] sm:$0xff]  ;;  %v258_v42 = vadd.f32 %v4877_v28, %v4874_v27  ;;  %v202_v22 = vsub.f32 %v4874_v27, %v4877_v28  ;;  %s6003_s9 = smov (!%p156_p7, %s4710_s9), 1 }
  0x3a   : > { %v314_v2 = vadd.s32 8, %v313_v1  ;;  %v317_v4 = vmul.u32 2, %v313_v1  ;;  %v264_v23 = vsub.f32 %v256_v13, %v4846_v10  ;;  %v288_v24 = vadd.f32 %v4846_v10, %v256_v13  ;;  %v4927_v50 = vld [vmem:[%s4833_s23 + $0xd0] sm:$0xff]  ;;  %v4937_v57 = vld [vmem:[%s4833_s23 + $0x18] sm:$0xff]  ;;  %s3681_s17 = sshll.u32 %s6003_s9, 6 }
  0x3b   : > { %v4889_v32 = vadd.f32 %v4858_v19, %v4860_v20  ;;  %v265_v33 = vsub.f32 %v257_v21, %v4858_v19  ;;  %v289_v41 = vadd.f32 %v4858_v19, %v257_v21  ;;  %v266_v51 = vsub.f32 %v258_v42, %v4904_v39  ;;  %v4940_v58 = vld [vmem:[%s4833_s23 + $0x58] sm:$0xff]  ;;  %s5790_s26 = scalar_lea.vmem %s5843_s1, %s3681_s17 }
  0x3c   : > { %v318_v5 = vmul.u32 2, %v314_v2  ;;  %v325_v6 = vadd.s32 1, %v317_v4  ;;  %vm4839_vm0 = vcmp.eq.s32.totalorder %v316_v3, %v317_v4  ;;  %v272_v35 = vsub.f32 %v264_v23, %v4853_v16  ;;  %v4960_v4 = vld [vmem:[%s4833_s23 + $0x98] sm:$0xff] }
  0x3d   : > { %v296_v36 = vadd.f32 %v4853_v16, %v288_v24  ;;  %v273_v40 = vsub.f32 %v265_v33, %v4871_v26  ;;  %v4919_v43 = vsel %vm4839_vm0, 1.0, %v5851_v17  ;;  %v297_v49 = vadd.f32 %v4871_v26, %v289_v41  ;;  %v4979_v23 = vld [vmem:[%s4833_s23 + $0xd8] sm:$0xff] }
  0x3e   : > { %v326_v11 = vadd.s32 1, %v318_v5  ;;  %vm327_vm2 = vcmp.eq.s32.totalorder %v316_v3, %v325_v6  ;;  %vm4862_vm3 = vcmp.eq.s32.totalorder %v316_v3, %v318_v5  ;;  %v280_v44 = vmul.f32 0.5, %v272_v35 }
  0x3f   : > { %v3652_v18 = vsel %vm327_vm2, 1.0, %v5851_v17  ;;  %v304_v45 = vmul.f32 0.5, %v296_v36  ;;  %v281_v48 = vmul.f32 0.5, %v273_v40  ;;  %v290_v52 = vadd.f32 %v4904_v39, %v258_v42  ;;  %vm4951_vm6 = vmpackc.low %vm4862_vm3, %vm4839_vm0 }
  0x40   : > { %vm328_vm4 = vcmp.eq.s32.totalorder %v316_v3, %v326_v11  ;;  %v4868_v25 = vsub.f32 %v3652_v18, %v3652_v18  ;;  %v335_v53 = vsel %vm333_vm1, %v280_v44, 0  ;;  %v305_v62 = vmul.f32 0.5, %v297_v49 }
  0x41   : > { %vm4880_vm5 = vmpackc.low %vm328_vm4, %vm327_vm2  ;;  %v3653_v30 = vsel %vm328_vm4, 1.0, %v5851_v17  ;;  %v1903_v54 = vsel %vm333_vm1, %v304_v45, 0  ;;  %v4942_v59 = vand.u32 4294901760, %v335_v53  ;;  %v338_v61 = vsel %vm333_vm1, %v281_v48, 0  ;;  %v4998_v45 = vld [vmem:[%s4833_s23 + $0x20] sm:$0xff] }
  0x42   : > { %4355 = vmatprep.subr.msk.bf16.mxu1 %vm4880_vm5, %v5849_v34  ;;  %4307 = vmatprep.subr.msk.bf16.mxu0 %vm4880_vm5, %v5849_v34  ;;  %v5854_v37 = vand.u32 4294901760, %v4868_v25  ;;  %v4901_v38 = vsub.f32 %v3653_v30, %v3653_v30  ;;  %v4944_v60 = vand.u32 4294901760, %v1903_v54  ;;  %v5915_v63 = vsel %vm4951_vm6, 4294967295, %v5914_v63 }
  0x43   : > { %4357 = vmatpush3.bf16.msk.msra.mxu1 %vm4880_vm5, %v5849_v34  ;;  %4309 = vmatpush3.bf16.msk.msra.mxu0 %vm4880_vm5, %v5849_v34  ;;  %5916 = vst [vmem:[#allocation5_spill] sm:$0xff] %v5915_v63  ;;  %v4955_v1 = vand.u32 4294901760, %v338_v61  ;;  %v274_v2 = vsub.f32 %v266_v51, %v4927_v50  ;;  %v298_v3 = vadd.f32 %v4927_v50, %v290_v52  ;;  %v1906_v7 = vsel %vm333_vm1, %v305_v62, 0  ;;  %v5008_v52 = vld [vmem:[%s4833_s23 + $0x60] sm:$0xff]  ;;  %v5068_v34 = vld [vmem:[%s4833_s23 + $0xb0] sm:$0xff] }
  0x44   : > { %v509_v46 = vsub.f32 %v4868_v25, %v5854_v37  ;;  %v5852_v47 = vand.u32 4294901760, %v4901_v38  ;;  %v4963_v5 = vsub.f32 %v335_v53, %v4942_v59  ;;  %v4966_v6 = vsub.f32 %v1903_v54, %v4944_v60  ;;  %v5011_v53 = vld [vmem:[%s4833_s23 + $0x28] sm:$0xff]  ;;  %5924 = vst [vmem:[#allocation13_spill] sm:$0xff] %v5068_v34  ;;  %v5081_v63 = vld [vmem:[%s4833_s23 + $0xf0] sm:$0xff] }
  0x45   : > { %v259_v8 = vadd.f32 %v4940_v58, %v4937_v57  ;;  %v4972_v11 = vsub.f32 %v338_v61, %v4955_v1  ;;  %v4974_v13 = vand.u32 4294901760, %v1906_v7  ;;  %v282_v14 = vmul.f32 0.5, %v274_v2  ;;  %v5014_v54 = vld [vmem:[%s4833_s23 + $0x68] sm:$0xff]  ;;  %v5024_v2 = vld [vmem:[%s4833_s23 + $0x70] sm:$0xff]  ;;  %5927 = vst [vmem:[#allocation16_spill] sm:$0xff] %v5081_v63 }
  0x46   : > { %v510_v55 = vand.u32 4294901760, %v509_v46  ;;  %v516_v56 = vsub.f32 %v4901_v38, %v5852_v47  ;;  %5917 = vst [vmem:[#allocation6_spill] sm:$0xff] %v4966_v6  ;;  %v5847_v15 = vand.u32 4294901760, %v4963_v5  ;;  %v5846_v18 = vand.u32 4294901760, %v4966_v6  ;;  %5922 = vst [vmem:[#allocation11_spill] sm:$0xff] %v5024_v2 }
  0x47   : > { %5918 = vst [vmem:[#allocation7_spill] sm:$0xff] %v4972_v11  ;;  %v306_v21 = vmul.f32 0.5, %v298_v3  ;;  %v267_v24 = vsub.f32 %v259_v8, %v4960_v4  ;;  %v5845_v30 = vand.u32 4294901760, %v4972_v11  ;;  %v4984_v33 = vsub.f32 %v1906_v7, %v4974_v13 }
  0x48   : > { %v517_v0 = vand.u32 4294901760, %v516_v56  ;;  %v341_v35 = vsel %vm333_vm1, %v282_v14, 0  ;;  %v291_v36 = vadd.f32 %v4960_v4, %v259_v8  ;;  %v428_v40 = vsub.f32 %v4963_v5, %v5847_v15 }
  0x49   : > { %5919 = vst [vmem:[#allocation8_spill] sm:$0xff] %v4984_v33  ;;  %v1996_v41 = vsub.f32 %v4966_v6, %v5846_v18  ;;  %v4994_v42 = vand.u32 4294901760, %v341_v35  ;;  %v1909_v44 = vsel %vm333_vm1, %v306_v21, 0  ;;  %v438_v46 = vsub.f32 %v4972_v11, %v5845_v30  ;;  %v5033_v21 = vld [vmem:[%s4833_s23 + $0xa0] sm:$0xff]  ;;  %v5124_v11 = vld [vmem:[%s4833_s23 + $0xb8] sm:$0xff] }
  0x4a   : > { %v4310_v9 = vpack.c.bf16 %v517_v0, %v510_v55  ;;  %v5844_v48 = vand.u32 4294901760, %v4984_v33  ;;  %v5004_v49 = vand.u32 4294901760, %v1909_v44  ;;  %v275_v51 = vsub.f32 %v267_v24, %v4979_v23  ;;  %v5021_v0 = vld [vmem:[%s4833_s23 + $0x30] sm:$0xff]  ;;  %5933 = vst [vmem:[#allocation22_spill] sm:$0xff] %v5124_v11 }
  0x4b   : > { %v429_v55 = vand.u32 4294901760, %v428_v40  ;;  %v1997_v56 = vand.u32 4294901760, %v1996_v41  ;;  %v5017_v61 = vsub.f32 %v341_v35, %v4994_v42  ;;  %v299_v62 = vadd.f32 %v4979_v23, %v291_v36  ;;  %5921 = vst [vmem:[#allocation10_spill] sm:$0xff] %v5021_v0  ;;  %v5039_v40 = vld [vmem:[%s4833_s23 + $0xa8] sm:$0xff] }
  0x4c   : > { %4359 = vmatprep.subr.bf16.mxu1 %v4310_v9  ;;  %4311 = vmatprep.subr.bf16.mxu0 %v4310_v9  ;;  %v439_v3 = vand.u32 4294901760, %v438_v46  ;;  %v2006_v7 = vsub.f32 %v4984_v33, %v5844_v48  ;;  %v5030_v8 = vsub.f32 %v1909_v44, %v5004_v49  ;;  %v283_v14 = vmul.f32 0.5, %v275_v51 }
  0x4d   : > { %5920 = vst [vmem:[#allocation9_spill] sm:$0xff] %v5017_v61  ;;  %3926 = vmatprep.mubr.f32.mxu0 %v429_v55  ;;  %4118 = vmatprep.mubr.f32.mxu1 %v1997_v56  ;;  %v5848_v24 = vand.u32 4294901760, %v5017_v61  ;;  %v307_v35 = vmul.f32 0.5, %v299_v62  ;;  %v260_v36 = vadd.f32 %v5008_v52, %v4998_v45  ;;  %v261_v41 = vadd.f32 %v5014_v54, %v5011_v53  ;;  %v5046_v55 = vld [vmem:[%s4833_s23 + $0xe0] sm:$0xff] }
  0x4e   : > { %5923 = vst [vmem:[#allocation12_spill] sm:$0xff] %v5030_v8  ;;  %3927 = vmatmul.mubr.f32.vlgmr.msra.gmra.mrb[0].mxu0 %v439_v3  ;;  %v2007_v44 = vand.u32 4294901760, %v2006_v7  ;;  %v5853_v46 = vand.u32 4294901760, %v5030_v8  ;;  %v344_v51 = vsel %vm333_vm1, %v283_v14, 0  ;;  %v262_v56 = vadd.f32 %v5024_v2, %v5021_v0  ;;  %v5058_v7 = vld [vmem:[%s4833_s23 + $0xe8] sm:$0xff] }
  0x4f   : > { %v448_v62 = vsub.f32 %v5017_v61, %v5848_v24  ;;  %v5053_v48 = vand.u32 4294901760, %v344_v51  ;;  %v1912_v30 = vsel %vm333_vm1, %v307_v35, 0  ;;  %v268_v3 = vsub.f32 %v260_v36, %v5033_v21  ;;  %4313 = vmatpush3.bf16.msra.mxu0 %v4310_v9  ;;  %v5104_v61 = vld [vmem:[%s4833_s23 + $0x78] sm:$0xff] }
  0x50   : > { %4119 = vmatmul.mubr.f32.vlgmr.msra.gmra.mrb[0].mxu1 %v2007_v44  ;;  %v2016_v14 = vsub.f32 %v5030_v8, %v5853_v46  ;;  %v5063_v18 = vand.u32 4294901760, %v1912_v30  ;;  %v292_v15 = vadd.f32 %v5033_v21, %v260_v36  ;;  %v269_v24 = vsub.f32 %v261_v41, %v5039_v40  ;;  %5929 = vst [vmem:[#allocation18_spill] sm:$0xff] %v5104_v61 }
  0x51   : > { %4361 = vmatpush3.bf16.msra.mxu1 %v4310_v9  ;;  %v449_v35 = vand.u32 4294901760, %v448_v62  ;;  %v5071_v31 = vsub.f32 %v344_v51, %v5053_v48  ;;  %v276_v17 = vsub.f32 %v268_v3, %v5046_v55  ;;  %v293_v44 = vadd.f32 %v5039_v40, %v261_v41 }
  0x52   : > { %v2017_v47 = vand.u32 4294901760, %v2016_v14  ;;  %v5076_v46 = vsub.f32 %v1912_v30, %v5063_v18  ;;  %v300_v37 = vadd.f32 %v5046_v55, %v292_v15  ;;  %v277_v36 = vsub.f32 %v269_v24, %v5058_v7 }
  0x53   : > { %5925 = vst [vmem:[#allocation14_spill] sm:$0xff] %v5071_v31  ;;  %3929 = vmatprep.mubr.f32.mxu0 %v449_v35  ;;  %v5861_v9 = vand.u32 4294901760, %v5071_v31  ;;  %v284_v62 = vmul.f32 0.5, %v276_v17  ;;  %v301_v51 = vadd.f32 %v5058_v7, %v293_v44  ;;  %v270_v41 = vsub.f32 %v262_v56, %v5068_v34 }
  0x54   : > { %5926 = vst [vmem:[#allocation15_spill] sm:$0xff] %v5076_v46  ;;  %4121 = vmatprep.mubr.f32.mxu1 %v2017_v47  ;;  %v5864_v30 = vand.u32 4294901760, %v5076_v46  ;;  %v308_v3 = vmul.f32 0.5, %v300_v37  ;;  %v285_v14 = vmul.f32 0.5, %v277_v36  ;;  %v294_v15 = vadd.f32 %v5068_v34, %v262_v56  ;;  %v5101_v36 = vld [vmem:[%s4833_s23 + $0x38] sm:$0xff]  ;;  %v5951_v27 = vld [vmem:[#allocation9_spill] sm:$0xff] }
  0x55   : > { %v458_v24 = vsub.f32 %v5071_v31, %v5861_v9  ;;  %v347_v35 = vsel %vm333_vm1, %v284_v62, 0  ;;  %v309_v17 = vmul.f32 0.5, %v301_v51  ;;  %v278_v8 = vsub.f32 %v270_v41, %v5081_v63  ;;  %5928 = vst [vmem:[#allocation17_spill] sm:$0xff] %v5101_v36  ;;  %v5142_v34 = vld [vmem:[%s4833_s23 + $0xf8] sm:$0xff] }
  0x56   : > { %v2026_v44 = vsub.f32 %v5076_v46, %v5864_v30  ;;  %v5096_v47 = vand.u32 4294901760, %v347_v35  ;;  %v1915_v37 = vsel %vm333_vm1, %v308_v3, 0  ;;  %v350_v56 = vsel %vm333_vm1, %v285_v14, 0 }
  0x57   : > { %v459_v9 = vand.u32 4294901760, %v458_v24  ;;  %v5106_v62 = vand.u32 4294901760, %v1915_v37  ;;  %v5108_v51 = vand.u32 4294901760, %v350_v56  ;;  %v1918_v41 = vsel %vm333_vm1, %v309_v17, 0 }
  0x58   : > { %v2027_v31 = vand.u32 4294901760, %v2026_v44  ;;  %v5112_v30 = vsub.f32 %v347_v35, %v5096_v47  ;;  %v5114_v46 = vand.u32 4294901760, %v1918_v41  ;;  %v286_v3 = vmul.f32 0.5, %v278_v8 }
  0x59   : > { %3930 = vmatmul.mubr.f32.gmra.mrb[2].mxu0 %v459_v9  ;;  %v5117_v14 = vsub.f32 %v1915_v37, %v5106_v62  ;;  %v5120_v24 = vsub.f32 %v350_v56, %v5108_v51  ;;  %v302_v33 = vadd.f32 %v5081_v63, %v294_v15  ;;  %v263_v17 = vadd.f32 %v5104_v61, %v5101_v36 }
  0x5a   : > { %5930 = vst [vmem:[#allocation19_spill] sm:$0xff] %v5112_v30  ;;  %4122 = vmatmul.mubr.f32.gmra.mrb[2].mxu1 %v2027_v31  ;;  %v5878_v35 = vand.u32 4294901760, %v5112_v30  ;;  %v5130_v8 = vsub.f32 %v1918_v41, %v5114_v46  ;;  %v353_v9 = vsel %vm333_vm1, %v286_v3, 0  ;;  %v5135_v44 = vpack.c.bf16 %v4901_v38, %v4868_v25 }
  0x5b   : > { %5931 = vst [vmem:[#allocation20_spill] sm:$0xff] %v5117_v14  ;;  %5932 = vst [vmem:[#allocation21_spill] sm:$0xff] %v5120_v24  ;;  %v5886_v37 = vand.u32 4294901760, %v5117_v14  ;;  %v5889_v15 = vand.u32 4294901760, %v5120_v24  ;;  %v5139_v56 = vand.u32 4294901760, %v353_v9  ;;  %v310_v63 = vmul.f32 0.5, %v302_v33 }
  0x5c   : > { %5934 = vst [vmem:[#allocation23_spill] sm:$0xff] %v5130_v8  ;;  %v468_v31 = vsub.f32 %v5112_v30, %v5878_v35  ;;  %v271_v3 = vsub.f32 %v263_v17, %v5124_v11  ;;  %v295_v6 = vadd.f32 %v5124_v11, %v263_v17  ;;  %4363 = vmatprep.subr.bf16.mxu1 %v5135_v44  ;;  %v5935_v17 = vand.u32 4294901760, %v5130_v8 }
  0x5d   : > { %4315 = vmatprep.subr.bf16.mxu0 %v5135_v44  ;;  %v2036_v33 = vsub.f32 %v5117_v14, %v5886_v37  ;;  %v478_v36 = vsub.f32 %v5120_v24, %v5889_v15  ;;  %v5159_v35 = vsub.f32 %v353_v9, %v5139_v56  ;;  %v1921_v41 = vsel %vm333_vm1, %v310_v63, 0 }
  0x5e   : > { %v469_v30 = vand.u32 4294901760, %v468_v31  ;;  %v2046_v11 = vsub.f32 %v5130_v8, %v5935_v17  ;;  %v5165_v61 = vand.u32 4294901760, %v1921_v41  ;;  %v279_v0 = vsub.f32 %v271_v3, %v5142_v34 }
  0x5f   : > { %v2037_v2 = vand.u32 4294901760, %v2036_v33  ;;  %v479_v37 = vand.u32 4294901760, %v478_v36  ;;  %v5896_v14 = vand.u32 4294901760, %v5159_v35  ;;  %v303_v15 = vadd.f32 %v5142_v34, %v295_v6 }
  0x60   : > { %3932 = vmatprep.mubr.f32.mxu0 %v469_v30  ;;  %v2047_v9 = vand.u32 4294901760, %v2046_v11  ;;  %v5171_v24 = vsub.f32 %v1921_v41, %v5165_v61  ;;  %v287_v63 = vmul.f32 0.5, %v279_v0  ;;  %v5936_v31 = vand.u32 4294901760, %v4868_v25 }
  0x61   : > { %v5937_v17 = vand.u32 4294901760, %v4901_v38  ;;  %4124 = vmatprep.mubr.f32.mxu1 %v2037_v2  ;;  %3933 = vmatmul.mubr.f32.gmra.mrb[4].mxu0 %v479_v37  ;;  %v488_v36 = vsub.f32 %v5159_v35, %v5896_v14  ;;  %v311_v3 = vmul.f32 0.5, %v303_v15  ;;  %v208_v6 = vsub.f32 %v4848_v12, %v4846_v10 }
  0x62   : > { %v5186_v11 = vadd.f32 %v4846_v10, %v4848_v12  ;;  %4125 = vmatmul.mubr.f32.gmra.mrb[4].mxu1 %v2047_v9  ;;  %v5894_v25 = vand.u32 4294901760, %v5171_v24  ;;  %v356_v38 = vsel %vm333_vm1, %v287_v63, 0  ;;  %v5938_v0 = vmov 0.0  }
  0x63   : > { %v5177_v8 = vpack.c.bf16 %v5937_v17, %v5936_v31  ;;  %v3651_v2 = vsel %vm4862_vm3, 1.0, %v5938_v0  ;;  %v5195_v30 = vsub.f32 %v4919_v43, %v4919_v43  ;;  %v489_v37 = vand.u32 4294901760, %v488_v36 }
  0x64   : > { %v5197_v15 = vand.u32 4294901760, %v356_v38  ;;  %v1924_v41 = vsel %vm333_vm1, %v311_v3, 0  ;;  %v5201_v10 = vadd.f32 %v4853_v16, %v208_v6  ;;  %v2056_v12 = vsub.f32 %v5171_v24, %v5894_v25 }
  0x65   : > { %v5206_v33 = vand.u32 4294901760, %v1924_v41  ;;  %v5899_v43 = vand.u32 4294901760, %v5195_v30  ;;  %3935 = vmatprep.mubr.f32.mxu0 %v489_v37  ;;  %v5214_v63 = vsub.f32 %v3651_v2, %v3651_v2  ;;  %v5939_v31 = vsub.f32 %v4860_v20, %v4858_v19 }
  0x66   : > { %v5212_v9 = vsub.f32 %v356_v38, %v5197_v15  ;;  %v2057_v36 = vand.u32 4294901760, %v2056_v12  ;;  %v5248_v14 = vadd.f32 %v4904_v39, %v202_v22  ;;  %v203_v12 = vsub.f32 %v4937_v57, %v4940_v58  ;;  %v5950_v57 = vld [vmem:[#allocation8_spill] sm:$0xff] }
  0x67   : > { %v5220_v17 = vadd.f32 %v4871_v26, %v5939_v31  ;;  %v5223_v3 = vsub.f32 %v1924_v41, %v5206_v33  ;;  %v1293_v6 = vsub.f32 %v5195_v30, %v5899_v43  ;;  %v5898_v38 = vand.u32 4294901760, %v5214_v63  ;;  %v5958_v43 = vld [vmem:[#allocation20_spill] sm:$0xff] }
  0x68   : > { %v5895_v0 = vand.u32 4294901760, %v5212_v9  ;;  %4127 = vmatprep.mubr.f32.mxu1 %v2057_v36  ;;  %v211_v28 = vsub.f32 %v203_v12, %v4960_v4  ;;  %v204_v58 = vsub.f32 %v4998_v45, %v5008_v52  ;;  %vm3470_vm7 = vcmask 261120  }
  0x69   : > { %v5897_v2 = vand.u32 4294901760, %v5223_v3  ;;  %v1294_v20 = vand.u32 4294901760, %v1293_v6  ;;  %v1300_v37 = vsub.f32 %v5214_v63, %v5898_v38  ;;  %v210_v6 = vsub.f32 %v202_v22, %v4904_v39  ;;  %v5957_v38 = vld [vmem:[#allocation19_spill] sm:$0xff] }
  0x6a   : > { %v498_v19 = vsub.f32 %v5212_v9, %v5895_v0  ;;  %v5267_v39 = vadd.f32 %v4979_v23, %v211_v28  ;;  %v212_v45 = vsub.f32 %v204_v58, %v5033_v21  ;;  %v5287_v52 = vadd.f32 %v5033_v21, %v204_v58  ;;  %v5946_v28 = vld [vmem:[#allocation6_spill] sm:$0xff]  ;;  %v5947_v58 = vld [vmem:[#allocation13_spill] sm:$0xff] }
  0x6b   : > { %v2066_v41 = vsub.f32 %v5223_v3, %v5897_v2  ;;  %v1301_v36 = vand.u32 4294901760, %v1300_v37  ;;  %v5949_v37 = vld [vmem:[#allocation22_spill] sm:$0xff]  ;;  %v5952_v2 = vld [vmem:[#allocation16_spill] sm:$0xff]  ;;  %vm3511_vm8 = vcmask 523520  }
  0x6c   : > { %v499_v31 = vand.u32 4294901760, %v498_v19  ;;  %v5255_v19 = vadd.f32 %v4927_v50, %v210_v6 }
  0x6d   : > { %v2067_v25 = vand.u32 4294901760, %v2066_v41  ;;  %v5244_v0 = vpack.c.bf16 %v1301_v36, %v1294_v20  ;;  %v5261_v20 = vadd.f32 %v4960_v4, %v203_v12  ;;  %v205_v4 = vsub.f32 %v5011_v53, %v5014_v54  ;;  %v5943_v41 = vld [vmem:[#allocation10_spill] sm:$0xff]  ;;  %v5945_v36 = vld [vmem:[#allocation17_spill] sm:$0xff] }
  0x6e   : > { %3936 = vmatmul.mubr.f32.gmra.mrb[6].mxu0 %v499_v31  ;;  %v5293_v53 = vadd.f32 %v5046_v55, %v212_v45  ;;  %v5944_v31 = vld [vmem:[#allocation18_spill] sm:$0xff]  ;;  %v5948_v45 = vld [vmem:[#allocation7_spill] sm:$0xff]  ;;  %v226_v29 = vmul.f32 0.5, %v5255_v19 }
  0x6f   : > { %5940 = vst [vmem:[#allocation24_spill] sm:$0xff] %v5244_v0  ;;  %4128 = vmatmul.mubr.f32.gmra.mrb[6].mxu1 %v2067_v25  ;;  %3942 = vmatprep.mubr.f32.mxu0 %v4942_v59  ;;  %v5941_v25 = vmov 1.0|1.0   ;;  %v5300_v22 = vadd.f32 %v5039_v40, %v205_v4  ;;  %v207_v6 = vsub.f32 %v5945_v36, %v5944_v31  ;;  %v5955_v36 = vld [vmem:[#allocation14_spill] sm:$0xff]  ;;  %v5959_v0 = vand.u32 4294901760, %v5195_v30 }
  0x70   : > { %4134 = vmatprep.mubr.f32.mxu1 %v4944_v60  ;;  %v5351_v31 = vpack.c.bf16 %v5214_v63, %v5195_v30  ;;  %v5965_v30 = vand.u32 4294901760, %v5946_v28 }
  0x71   : > { %v215_v54 = vsub.f32 %v207_v6, %v5949_v37 }
  0x72   : > { %3943 = vmatmul.mubr.f32.vlgmr.msra.gmra.mrb[0].mxu0 %v4955_v1 }
  0x73   : > { %4135 = vmatmul.mubr.f32.vlgmr.msra.gmra.mrb[0].mxu1 %v4974_v13  ;;  %3945 = vmatprep.mubr.f32.mxu0 %v4994_v42 }
  0x74   : > { %4365 = vmatpush3.bf16.msra.mxu1 %v5135_v44  ;;  %4137 = vmatprep.mubr.f32.mxu1 %v5004_v49 }
  0x75   : > { %4317 = vmatpush3.bf16.msra.mxu0 %v5135_v44  ;;  %4367 = vmatprep.subr.msk.bf16.mxu1 %vm4880_vm5, %v5941_v25  ;;  %v213_v44 = vsub.f32 %v205_v4, %v5039_v40  ;;  %v5942_v40 = vld [vmem:[#allocation11_spill] sm:$0xff] }
  0x76   : > { %3946 = vmatmul.mubr.f32.gmra.mrb[2].mxu0 %v5053_v48  ;;  %4319 = vmatprep.subr.msk.bf16.mxu0 %vm4880_vm5, %v5941_v25  ;;  %v206_v12 = vsub.f32 %v5943_v41, %v5942_v40  ;;  %v5953_v41 = vld [vmem:[#allocation12_spill] sm:$0xff] }
  0x77   : > { %4138 = vmatmul.mubr.f32.gmra.mrb[2].mxu1 %v5063_v18  ;;  %3948 = vmatprep.mubr.f32.mxu0 %v5096_v47  ;;  %v5305_v21 = vadd.f32 %v5058_v7, %v213_v44 }
  0x78   : > { %4140 = vmatprep.mubr.f32.mxu1 %v5106_v62  ;;  %v214_v4 = vsub.f32 %v206_v12, %v5947_v58  ;;  %v5321_v44 = vadd.f32 %v5947_v58, %v206_v12  ;;  %v5340_v12 = vadd.f32 %v5142_v34, %v215_v54  ;;  %v5345_v58 = vadd.f32 %v5949_v37, %v207_v6  ;;  %v5962_v37 = vld [vmem:[#allocation21_spill] sm:$0xff]  ;;  %v5963_v6 = vld [vmem:[#allocation23_spill] sm:$0xff] }
  0x79   : > { %v5964_v54 = vand.u32 4294901760, %v4963_v5 }
  0x7a   : > { %3949 = vmatmul.mubr.f32.gmra.mrb[4].mxu0 %v5108_v51  ;;  %v5327_v40 = vadd.f32 %v5952_v2, %v214_v4  ;;  %5954 = vst [vmem:[#allocation11_spill] sm:$0xff] %v5340_v12  ;;  %v5956_v4 = vld [vmem:[#allocation15_spill] sm:$0xff]  ;;  %v5960_v12 = vand.u32 4294901760, %v5214_v63  ;;  %v5966_v63 = vand.u32 4294901760, %v5948_v45 }
  0x7b   : > { %4141 = vmatmul.mubr.f32.gmra.mrb[4].mxu1 %v5114_v46  ;;  %3951 = vmatprep.mubr.f32.mxu0 %v5139_v56 }
  0x7c   : > { %4143 = vmatprep.mubr.f32.mxu1 %v5165_v61  ;;  %v5360_v2 = vpack.c.bf16 %v5960_v12, %v5959_v0  ;;  %v5967_v0 = vand.u32 4294901760, %v5950_v57  ;;  %v5968_v12 = vand.u32 4294901760, %v5951_v27 }
  0x7e   : > { %3952 = vmatmul.mubr.f32.gmra.mrb[6].mxu0 %v5197_v15  ;;  %5961 = vst [vmem:[#allocation10_spill] sm:$0xff] %v5360_v2  ;;  %v5969_v2 = vand.u32 4294901760, %v5953_v41 }
  0x7f   : > { %4144 = vmatmul.mubr.f32.gmra.mrb[6].mxu1 %v5206_v33  ;;  %3958 = vmatprep.mubr.f32.mxu0 %v4963_v5  ;;  %v5970_v5 = vand.u32 4294901760, %v5955_v36 }
  0x80   : > { %4150 = vmatprep.mubr.f32.mxu1 %v5946_v28  ;;  %v5975_v28 = vand.u32 4294901760, %v5963_v6 }
  0x82   : > { %3959 = vmatmul.mubr.f32.vlgmr.msra.gmra.mrb[0].mxu0 %v5948_v45  ;;  %v5976_v45 = vand.u32 4294901760, %v5159_v35 }
  0x83   : > { %4151 = vmatmul.mubr.f32.vlgmr.msra.gmra.mrb[0].mxu1 %v5950_v57  ;;  %3961 = vmatprep.mubr.f32.mxu0 %v5951_v27  ;;  %v5971_v27 = vand.u32 4294901760, %v5956_v4  ;;  %v5972_v57 = vand.u32 4294901760, %v5957_v38 }
  0x84   : > { %4369 = vmatpush3.bf16.msk.msra.mxu1 %vm4880_vm5, %v5941_v25  ;;  %4153 = vmatprep.mubr.f32.mxu1 %v5953_v41  ;;  %v5977_v41 = vand.u32 4294901760, %v5171_v24 }
  0x85   : > { %4321 = vmatpush3.bf16.msk.msra.mxu0 %vm4880_vm5, %v5941_v25  ;;  %4371 = vmatprep.subr.bf16.mxu1 %v5177_v8 }
  0x86   : > { %3962 = vmatmul.mubr.f32.gmra.mrb[2].mxu0 %v5955_v36  ;;  %4323 = vmatprep.subr.bf16.mxu0 %v5177_v8  ;;  %v5978_v36 = vand.u32 4294901760, %v5212_v9 }
  0x87   : > { %4154 = vmatmul.mubr.f32.gmra.mrb[2].mxu1 %v5956_v4  ;;  %3964 = vmatprep.mubr.f32.mxu0 %v5957_v38  ;;  %v5979_v38 = vand.u32 4294901760, %v5223_v3 }
  0x88   : > { %4156 = vmatprep.mubr.f32.mxu1 %v5958_v43 }
  0x8a   : > { %3965 = vmatmul.mubr.f32.gmra.mrb[4].mxu0 %v5962_v37 }
  0x8b   : > { %4157 = vmatmul.mubr.f32.gmra.mrb[4].mxu1 %v5963_v6  ;;  %3967 = vmatprep.mubr.f32.mxu0 %v5159_v35  ;;  %v5980_v35 = vsub.f32 %v5186_v11, %v4853_v16  ;;  %v5982_v11 = vsub.f32 %v4889_v32, %v4871_v26 }
  0x8c   : > { %4159 = vmatprep.mubr.f32.mxu1 %v5171_v24 }
  0x8d   : > { %v249_v4 = vmul.f32 0.5, %v5982_v11  ;;  %v5989_v11 = vld [vmem:[#allocation11_spill] sm:$0xff] }
  0x8e   : > { %3968 = vmatmul.mubr.f32.gmra.mrb[6].mxu0 %v5212_v9  ;;  %v248_v9 = vmul.f32 0.5, %v5980_v35 }
  0x8f   : > { %4160 = vmatmul.mubr.f32.gmra.mrb[6].mxu1 %v5223_v3  ;;  %3974 = vmatprep.mubr.f32.mxu0 %v5964_v54  ;;  %v225_v3 = vmul.f32 0.5, %v5220_v17  ;;  %v5983_v54 = vsub.f32 %v5248_v14, %v4927_v50  ;;  %v2690_v19 = vsel %vm333_vm1, %v249_v4, 0  ;;  %v227_v50 = vmul.f32 0.5, %v5267_v39 }
  0x90   : > { %4166 = vmatprep.mubr.f32.mxu1 %v5965_v30  ;;  %v2687_v17 = vsel %vm333_vm1, %v248_v9, 0  ;;  %v1125_v30 = vsel %vm333_vm1, %v226_v29, 0  ;;  %v5984_v14 = vsub.f32 %v5261_v20, %v4979_v23  ;;  %v231_v4 = vmul.f32 0.5, %v5989_v11 }
  0x91   : > { %v1122_v6 = vsel %vm333_vm1, %v225_v3, 0  ;;  %v5451_v32 = vand.u32 4294901760, %v2687_v17 }
  0x92   : > { %3975 = vmatmul.mubr.f32.vlgmr.msra.gmra.mrb[0].mxu0 %v5966_v63  ;;  %v251_v63 = vmul.f32 0.5, %v5984_v14 }
  0x93   : > { %4167 = vmatmul.mubr.f32.vlgmr.msra.gmra.mrb[0].mxu1 %v5967_v0  ;;  %3977 = vmatprep.mubr.f32.mxu0 %v5968_v12  ;;  %v5462_v0 = vand.u32 4294901760, %v1122_v6  ;;  %v5476_v20 = vsub.f32 %v2687_v17, %v5451_v32  ;;  %v5990_v17 = vsub.f32 %v5345_v58, %v5142_v34 }
  0x94   : > { %4373 = vmatpush3.bf16.msra.mxu1 %v5177_v8  ;;  %4169 = vmatprep.mubr.f32.mxu1 %v5969_v2  ;;  %v5973_v2 = vand.u32 4294901760, %v5958_v43  ;;  %v224_v43 = vmul.f32 0.5, %v5201_v10 }
  0x95   : > { %4325 = vmatpush3.bf16.msra.mxu0 %v5177_v8  ;;  %4375 = vmatprep.subr.msk.bf16.mxu1 %vm4880_vm5, %v5941_v25  ;;  %v5974_v8 = vand.u32 4294901760, %v5962_v37  ;;  %v250_v37 = vmul.f32 0.5, %v5983_v54  ;;  %v255_v54 = vmul.f32 0.5, %v5990_v17 }
  0x96   : > { %3978 = vmatmul.mubr.f32.gmra.mrb[2].mxu0 %v5970_v5  ;;  %4327 = vmatprep.subr.msk.bf16.mxu0 %vm4880_vm5, %v5941_v25  ;;  %v1119_v24 = vsel %vm333_vm1, %v224_v43, 0  ;;  %v228_v5 = vmul.f32 0.5, %v5293_v53 }
  0x97   : > { %4170 = vmatmul.mubr.f32.gmra.mrb[2].mxu1 %v5971_v27  ;;  %3980 = vmatprep.mubr.f32.mxu0 %v5972_v57  ;;  %v5433_v16 = vand.u32 4294901760, %v1119_v24  ;;  %v2693_v12 = vsel %vm333_vm1, %v250_v37, 0  ;;  %v5466_v27 = vand.u32 4294901760, %v2690_v19  ;;  %v5468_v57 = vand.u32 4294901760, %v1125_v30  ;;  %v5991_v37 = vld [vmem:[#allocation24_spill] sm:$0xff] }
  0x98   : > { %4172 = vmatprep.mubr.f32.mxu1 %v5973_v2  ;;  %v5985_v2 = vsub.f32 %v5287_v52, %v5046_v55  ;;  %v5480_v53 = vand.u32 4294901760, %v2693_v12  ;;  %v229_v55 = vmul.f32 0.5, %v5305_v21  ;;  %v5487_v52 = vsub.f32 %v1122_v6, %v5462_v0 }
  0x99   : > { %v5449_v26 = vsub.f32 %v1119_v24, %v5433_v16  ;;  %v5498_v43 = vsub.f32 %v1125_v30, %v5468_v57 }
  0x9a   : > { %3981 = vmatmul.mubr.f32.gmra.mrb[4].mxu0 %v5974_v8  ;;  %v252_v39 = vmul.f32 0.5, %v5985_v2  ;;  %v1128_v8 = vsel %vm333_vm1, %v227_v50, 0  ;;  %v1221_v6 = vand.u32 4294901760, %v5487_v52 }
  0x9b   : > { %4173 = vmatmul.mubr.f32.gmra.mrb[4].mxu1 %v5975_v28  ;;  %3983 = vmatprep.mubr.f32.mxu0 %v5976_v45  ;;  %v1211_v23 = vand.u32 4294901760, %v5449_v26  ;;  %v2696_v28 = vsel %vm333_vm1, %v251_v63, 0  ;;  %v1131_v45 = vsel %vm333_vm1, %v228_v5, 0  ;;  %v1140_v5 = vsel %vm333_vm1, %v231_v4, 0 }
  0x9c   : > { %4175 = vmatprep.mubr.f32.mxu1 %v5977_v41  ;;  %v5986_v41 = vsub.f32 %v5300_v22, %v5058_v7  ;;  %v2699_v21 = vsel %vm333_vm1, %v252_v39, 0  ;;  %v2779_v22 = vand.u32 4294901760, %v5476_v20  ;;  %v5513_v9 = vand.u32 4294901760, %v2696_v28 }
  0x9d   : > { %v5508_v7 = vsub.f32 %v5449_v26, %v1211_v23  ;;  %v5520_v3 = vand.u32 4294901760, %v1131_v45  ;;  %v5528_v29 = vand.u32 4294901760, %v2699_v21 }
  0x9e   : > { %3984 = vmatmul.mubr.f32.gmra.mrb[6].mxu0 %v5978_v36  ;;  %v253_v36 = vmul.f32 0.5, %v5986_v41  ;;  %v2780_v34 = vsub.f32 %v5476_v20, %v2779_v22  ;;  %v5551_v50 = vsub.f32 %v2696_v28, %v5513_v9  ;;  %v1222_v28 = vsub.f32 %v5487_v52, %v1221_v6 }
  0x9f   : > { %4176 = vmatmul.mubr.f32.gmra.mrb[6].mxu1 %v5979_v38  ;;  %3990 = vmatprep.mubr.f32.mxu0 %v4942_v59  ;;  %v5495_v38 = vsub.f32 %v2690_v19, %v5466_v27  ;;  %v1231_v19 = vand.u32 4294901760, %v5498_v43  ;;  %v5569_v39 = vsub.f32 %v2699_v21, %v5528_v29 }
  0xa0   : > { %4182 = vmatprep.mubr.f32.mxu1 %v4944_v60  ;;  %v2809_v41 = vand.u32 4294901760, %v5551_v50 }
  0xa2   : > { %3991 = vmatmul.mubr.f32.vlgmr.msra.gmra.mrb[0].mxu0 %v4955_v1 }
  0xa3   : > { %4183 = vmatmul.mubr.f32.vlgmr.msra.gmra.mrb[0].mxu1 %v4974_v13  ;;  %3993 = vmatprep.mubr.f32.mxu0 %v4994_v42 }
  0xa4   : > { %4377 = vmatpush3.bf16.msk.msra.mxu1 %vm4880_vm5, %v5941_v25  ;;  %4185 = vmatprep.mubr.f32.mxu1 %v5004_v49 }
  0xa5   : > { %4329 = vmatpush3.bf16.msk.msra.mxu0 %vm4880_vm5, %v5941_v25  ;;  %4379 = vmatprep.subr.msk.bf16.mxu1 %vm4951_vm6, %v5941_v25 }
  0xa6   : > { %3994 = vmatmul.mubr.f32.gmra.mrb[2].mxu0 %v5053_v48  ;;  %4331 = vmatprep.subr.msk.bf16.mxu0 %vm4951_vm6, %v5941_v25 }
  0xa7   : > { %4186 = vmatmul.mubr.f32.gmra.mrb[2].mxu1 %v5063_v18  ;;  %3996 = vmatprep.mubr.f32.mxu0 %v5096_v47 }
  0xa8   : > { %4188 = vmatprep.mubr.f32.mxu1 %v5106_v62 }
  0xaa   : > { %3997 = vmatmul.mubr.f32.gmra.mrb[4].mxu0 %v5108_v51 }
  0xab   : > { %4189 = vmatmul.mubr.f32.gmra.mrb[4].mxu1 %v5114_v46  ;;  %3999 = vmatprep.mubr.f32.mxu0 %v5139_v56 }
  0xac   : > { %4191 = vmatprep.mubr.f32.mxu1 %v5165_v61 }
  0xae   : > { %4000 = vmatmul.mubr.f32.gmra.mrb[6].mxu0 %v5197_v15 }
  0xaf   : > { %4192 = vmatmul.mubr.f32.gmra.mrb[6].mxu1 %v5206_v33  ;;  %4006 = vmatprep.mubr.f32.mxu0 %v4942_v59  ;;  %v230_v59 = vmul.f32 0.5, %v5327_v40  ;;  %v5511_v40 = vand.u32 4294901760, %v1128_v8 }
  0xb0   : > { %4198 = vmatprep.mubr.f32.mxu1 %v4944_v60  ;;  %v5987_v60 = vld [vmem:[#allocation16_spill] sm:$0xff] }
  0xb1   : > { %v5988_v24 = vsub.f32 %v5321_v44, %v5987_v60  ;;  %v5518_v44 = vsub.f32 %v2693_v12, %v5480_v53  ;;  %v5548_v58 = vsub.f32 %v1128_v8, %v5511_v40 }
  0xb2   : > { %4007 = vmatmul.mubr.f32.vlgmr.msra.gmra.mrb[0].mxu0 %v4955_v1  ;;  %v1134_v1 = vsel %vm333_vm1, %v229_v55, 0 }
  0xb3   : > { %v254_v35 = vmul.f32 0.5, %v5988_v24  ;;  %4199 = vmatmul.mubr.f32.vlgmr.msra.gmra.mrb[0].mxu1 %v4974_v13  ;;  %4009 = vmatprep.mubr.f32.mxu0 %v4994_v42  ;;  %v2702_v13 = vsel %vm333_vm1, %v253_v36, 0  ;;  %v1137_v42 = vsel %vm333_vm1, %v230_v59, 0  ;;  %v5553_v14 = vand.u32 4294901760, %v1134_v1 }
  0xb4   : > { %4381 = vmatpush3.bf16.msk.msra.mxu1 %vm4951_vm6, %v5941_v25  ;;  %4201 = vmatprep.mubr.f32.mxu1 %v5004_v49  ;;  %v2789_v49 = vand.u32 4294901760, %v5495_v38  ;;  %v5561_v63 = vand.u32 4294901760, %v2702_v13  ;;  %v5563_v12 = vand.u32 4294901760, %v1137_v42  ;;  %v2799_v2 = vand.u32 4294901760, %v5518_v44 }
  0xb5   : > { %4333 = vmatpush3.bf16.msk.msra.mxu0 %vm4951_vm6, %v5941_v25  ;;  %4383 = vmatprep.subr.bf16.mxu1 %v5991_v37  ;;  %v2705_v30 = vsel %vm333_vm1, %v254_v35, 0  ;;  %v5588_v36 = vsub.f32 %v1134_v1, %v5553_v14  ;;  %v5590_v59 = vand.u32 4294901760, %v1140_v5  ;;  %v2781_v35 = vand.u32 4294901760, %v2780_v34 }
  0xb6   : > { %4010 = vmatmul.mubr.f32.gmra.mrb[2].mxu0 %v5053_v48  ;;  %4335 = vmatprep.subr.bf16.mxu0 %v5991_v37  ;;  %v5559_v48 = vsub.f32 %v1131_v45, %v5520_v3  ;;  %v5571_v8 = vand.u32 4294901760, %v2705_v30  ;;  %v2790_v55 = vsub.f32 %v5495_v38, %v2789_v49  ;;  %v1241_v45 = vand.u32 4294901760, %v5548_v58 }
  0xb7   : > { %4202 = vmatmul.mubr.f32.gmra.mrb[2].mxu1 %v5063_v18  ;;  %4012 = vmatprep.mubr.f32.mxu0 %v5096_v47  ;;  %v2708_v18 = vsel %vm333_vm1, %v255_v54, 0  ;;  %v1213_v47 = vand.u32 4294901760, %v5508_v7  ;;  %v5596_v60 = vsub.f32 %v2702_v13, %v5561_v63  ;;  %v2800_v7 = vsub.f32 %v5518_v44, %v2799_v2 }
  0xb8   : > { %4204 = vmatprep.mubr.f32.mxu1 %v5106_v62  ;;  %v1232_v62 = vsub.f32 %v5498_v43, %v1231_v19  ;;  %v5903_v21 = vand.u32 4294901760, %v5559_v48  ;;  %v5601_v24 = vand.u32 4294901760, %v2708_v18  ;;  %v1223_v1 = vand.u32 4294901760, %v1222_v28 }
  0xb9   : > { %v2791_v11 = vand.u32 4294901760, %v2790_v55  ;;  %v1242_v13 = vsub.f32 %v5548_v58, %v1241_v45  ;;  %v5620_v17 = vsub.f32 %v1140_v5, %v5590_v59  ;;  %v2829_v54 = vand.u32 4294901760, %v5596_v60 }
  0xba   : > { %4013 = vmatmul.mubr.f32.gmra.mrb[4].mxu0 %v5108_v51  ;;  %v5599_v51 = vsub.f32 %v1137_v42, %v5563_v12  ;;  %v1233_v4 = vand.u32 4294901760, %v1232_v62  ;;  %v1261_v42 = vand.u32 4294901760, %v5588_v36  ;;  %v5629_v34 = vsub.f32 %v2708_v18, %v5601_v24 }
  0xbb   : > { %4205 = vmatmul.mubr.f32.gmra.mrb[4].mxu1 %v5114_v46  ;;  %4015 = vmatprep.mubr.f32.mxu0 %v5139_v56  ;;  %v2819_v46 = vand.u32 4294901760, %v5569_v39  ;;  %v5609_v56 = vsub.f32 %v2705_v30, %v5571_v8  ;;  %v2801_v28 = vand.u32 4294901760, %v2800_v7 }
  0xbc   : > { %4207 = vmatprep.mubr.f32.mxu1 %v5165_v61  ;;  %v2810_v61 = vsub.f32 %v5551_v50, %v2809_v41  ;;  %v1271_v30 = vand.u32 4294901760, %v5599_v51  ;;  %v1262_v62 = vsub.f32 %v5588_v36, %v1261_v42 }
  0xbd   : > { %v2820_v5 = vsub.f32 %v5569_v39, %v2819_v46 }
  0xbe   : > { %4016 = vmatmul.mubr.f32.gmra.mrb[6].mxu0 %v5197_v15  ;;  %v1252_v15 = vsub.f32 %v5559_v48, %v5903_v21  ;;  %v2811_v55 = vand.u32 4294901760, %v2810_v61  ;;  %v1281_v21 = vand.u32 4294901760, %v5620_v17  ;;  %v1272_v7 = vsub.f32 %v5599_v51, %v1271_v30 }
  0xbf   : > { %4208 = vmatmul.mubr.f32.gmra.mrb[6].mxu1 %v5206_v33  ;;  %4022 = vmatprep.mubr.f32.mxu0 %v1213_v47  ;;  %v5904_v33 = vand.u32 4294901760, %v5609_v56  ;;  %v1243_v47 = vand.u32 4294901760, %v1242_v13  ;;  %v2821_v13 = vand.u32 4294901760, %v2820_v5 }
  0xc0   : > { %4214 = vmatprep.mubr.f32.mxu1 %v2781_v35  ;;  %v1253_v18 = vand.u32 4294901760, %v1252_v15  ;;  %v2830_v35 = vsub.f32 %v5596_v60, %v2829_v54  ;;  %v1282_v61 = vsub.f32 %v5620_v17, %v1281_v21 }
  0xc2   : > { %4023 = vmatmul.mubr.f32.vlgmr.msra.gmra.mrb[0].mxu0 %v1223_v1  ;;  %v2849_v1 = vand.u32 4294901760, %v5629_v34  ;;  %v2831_v15 = vand.u32 4294901760, %v2830_v35 }
  0xc3   : > { %4215 = vmatmul.mubr.f32.vlgmr.msra.gmra.mrb[0].mxu1 %v2791_v11  ;;  %4025 = vmatprep.mubr.f32.mxu0 %v1233_v4  ;;  %v2840_v11 = vsub.f32 %v5609_v56, %v5904_v33  ;;  %v1263_v4 = vand.u32 4294901760, %v1262_v62  ;;  %v1283_v33 = vand.u32 4294901760, %v1282_v61 }
  0xc4   : > { %4385 = vmatpush3.bf16.msra.mxu1 %v5991_v37  ;;  %4217 = vmatprep.mubr.f32.mxu1 %v2801_v28  ;;  %v1273_v28 = vand.u32 4294901760, %v1272_v7  ;;  %v2850_v5 = vsub.f32 %v5629_v34, %v2849_v1 }
  0xc5   : > { %4337 = vmatpush3.bf16.msra.mxu0 %v5991_v37  ;;  %4387 = vmatprep.subr.bf16.mxu1 %v5351_v31  ;;  %v2841_v37 = vand.u32 4294901760, %v2840_v11 }
  0xc6   : > { %4026 = vmatmul.mubr.f32.gmra.mrb[2].mxu0 %v1243_v47  ;;  %4339 = vmatprep.subr.bf16.mxu0 %v5351_v31  ;;  %v2851_v47 = vand.u32 4294901760, %v2850_v5 }
  0xc7   : > { %4218 = vmatmul.mubr.f32.gmra.mrb[2].mxu1 %v2811_v55  ;;  %4028 = vmatprep.mubr.f32.mxu0 %v1253_v18 }
  0xc8   : > { %4220 = vmatprep.mubr.f32.mxu1 %v2821_v13 }
  0xca   : > { %4029 = vmatmul.mubr.f32.gmra.mrb[4].mxu0 %v1263_v4 }
  0xcb   : > { %4221 = vmatmul.mubr.f32.gmra.mrb[4].mxu1 %v2831_v15  ;;  %4031 = vmatprep.mubr.f32.mxu0 %v1273_v28 }
  0xcc   : > { %4223 = vmatprep.mubr.f32.mxu1 %v2841_v37 }
  0xce   : > { %4032 = vmatmul.mubr.f32.gmra.mrb[6].mxu0 %v1283_v33 }
  0xcf   : > { %4224 = vmatmul.mubr.f32.gmra.mrb[6].mxu1 %v2851_v47  ;;  %4038 = vmatprep.mubr.f32.mxu0 %v5433_v16 }
  0xd0   : > { %4230 = vmatprep.mubr.f32.mxu1 %v5451_v32 }
  0xd2   : > { %4039 = vmatmul.mubr.f32.vlgmr.msra.gmra.mrb[0].mxu0 %v5462_v0 }
  0xd3   : > { %4231 = vmatmul.mubr.f32.vlgmr.msra.gmra.mrb[0].mxu1 %v5466_v27  ;;  %4041 = vmatprep.mubr.f32.mxu0 %v5468_v57 }
  0xd4   : > { %4389 = vmatpush3.bf16.msra.mxu1 %v5351_v31  ;;  %4233 = vmatprep.mubr.f32.mxu1 %v5480_v53 }
  0xd5   : > { %4341 = vmatpush3.bf16.msra.mxu0 %v5351_v31  ;;  %4391 = vmatprep.subr.msk.bf16.mxu1 %vm4951_vm6, %v5941_v25  ;;  %v5992_v31 = vld [vmem:[#allocation10_spill] sm:$0xff] }
  0xd6   : > { %4042 = vmatmul.mubr.f32.gmra.mrb[2].mxu0 %v5511_v40  ;;  %4343 = vmatprep.subr.msk.bf16.mxu0 %vm4951_vm6, %v5941_v25 }
  0xd7   : > { %4234 = vmatmul.mubr.f32.gmra.mrb[2].mxu1 %v5513_v9  ;;  %4044 = vmatprep.mubr.f32.mxu0 %v5520_v3 }
  0xd8   : > { %4236 = vmatprep.mubr.f32.mxu1 %v5528_v29 }
  0xda   : > { %4045 = vmatmul.mubr.f32.gmra.mrb[4].mxu0 %v5553_v14 }
  0xdb   : > { %4237 = vmatmul.mubr.f32.gmra.mrb[4].mxu1 %v5561_v63  ;;  %4047 = vmatprep.mubr.f32.mxu0 %v5563_v12 }
  0xdc   : > { %4239 = vmatprep.mubr.f32.mxu1 %v5571_v8 }
  0xde   : > { %4048 = vmatmul.mubr.f32.gmra.mrb[6].mxu0 %v5590_v59 }
  0xdf   : > { %4240 = vmatmul.mubr.f32.gmra.mrb[6].mxu1 %v5601_v24  ;;  %4054 = vmatprep.mubr.f32.mxu0 %v5449_v26  ;;  %v5993_v26 = vand.u32 4294901760, %v5559_v48 }
  0xe0   : > { %4246 = vmatprep.mubr.f32.mxu1 %v5476_v20 }
  0xe2   : > { %4055 = vmatmul.mubr.f32.vlgmr.msra.gmra.mrb[0].mxu0 %v5487_v52 }
  0xe3   : > { %4247 = vmatmul.mubr.f32.vlgmr.msra.gmra.mrb[0].mxu1 %v5495_v38  ;;  %4057 = vmatprep.mubr.f32.mxu0 %v5498_v43 }
  0xe4   : > { %4393 = vmatpush3.bf16.msk.msra.mxu1 %vm4951_vm6, %v5941_v25  ;;  %4249 = vmatprep.mubr.f32.mxu1 %v5518_v44 }
  0xe5   : > { %4345 = vmatpush3.bf16.msk.msra.mxu0 %vm4951_vm6, %v5941_v25  ;;  %4395 = vmatprep.subr.bf16.mxu1 %v5992_v31 }
  0xe6   : > { %4058 = vmatmul.mubr.f32.gmra.mrb[2].mxu0 %v5548_v58  ;;  %4347 = vmatprep.subr.bf16.mxu0 %v5992_v31 }
  0xe7   : > { %4250 = vmatmul.mubr.f32.gmra.mrb[2].mxu1 %v5551_v50  ;;  %4060 = vmatprep.mubr.f32.mxu0 %v5559_v48 }
  0xe8   : > { %4252 = vmatprep.mubr.f32.mxu1 %v5569_v39 }
  0xea   : > { %4061 = vmatmul.mubr.f32.gmra.mrb[4].mxu0 %v5588_v36 }
  0xeb   : > { %4253 = vmatmul.mubr.f32.gmra.mrb[4].mxu1 %v5596_v60  ;;  %4063 = vmatprep.mubr.f32.mxu0 %v5599_v51 }
  0xec   : > { %4255 = vmatprep.mubr.f32.mxu1 %v5609_v56 }
  0xee   : > { %4064 = vmatmul.mubr.f32.gmra.mrb[6].mxu0 %v5620_v17 }
  0xef   : > { %4256 = vmatmul.mubr.f32.gmra.mrb[6].mxu1 %v5629_v34  ;;  %4070 = vmatprep.mubr.f32.mxu0 %v1211_v23  ;;  %v5994_v23 = vand.u32 4294901760, %v5609_v56 }
  0xf0   : > { %4262 = vmatprep.mubr.f32.mxu1 %v2779_v22 }
  0xf2   : > { %4071 = vmatmul.mubr.f32.vlgmr.msra.gmra.mrb[0].mxu0 %v1221_v6 }
  0xf3   : > { %4263 = vmatmul.mubr.f32.vlgmr.msra.gmra.mrb[0].mxu1 %v2789_v49  ;;  %4073 = vmatprep.mubr.f32.mxu0 %v1231_v19 }
  0xf4   : > { %4397 = vmatpush3.bf16.msra.mxu1 %v5992_v31  ;;  %4265 = vmatprep.mubr.f32.mxu1 %v2799_v2 }
  0xf5   : > { %4349 = vmatpush3.bf16.msra.mxu0 %v5992_v31  ;;  %4399 = vmatprep.subr.msk.bf16.mxu1 %vm4951_vm6, %v5941_v25 }
  0xf6   : > { %4074 = vmatmul.mubr.f32.gmra.mrb[2].mxu0 %v1241_v45  ;;  %4351 = vmatprep.subr.msk.bf16.mxu0 %vm4951_vm6, %v5941_v25 }
  0xf7   : > { %4266 = vmatmul.mubr.f32.gmra.mrb[2].mxu1 %v2809_v41  ;;  %4076 = vmatprep.mubr.f32.mxu0 %v5993_v26 }
  0xf8   : > { %4268 = vmatprep.mubr.f32.mxu1 %v2819_v46 }
  0xfa   : > { %4077 = vmatmul.mubr.f32.gmra.mrb[4].mxu0 %v1261_v42 }
  0xfb   : > { %4269 = vmatmul.mubr.f32.gmra.mrb[4].mxu1 %v2829_v54  ;;  %4079 = vmatprep.mubr.f32.mxu0 %v1271_v30 }
  0xfc   : > { %4271 = vmatprep.mubr.f32.mxu1 %v5994_v23 }
  0xfe   : > { %4080 = vmatmul.mubr.f32.gmra.mrb[6].mxu0 %v1281_v21 }
  0xff   : > { %4272 = vmatmul.mubr.f32.gmra.mrb[6].mxu1 %v2849_v1  ;;  %4086 = vmatprep.mubr.f32.mxu0 %v5433_v16 }
 0x100   : > { %4278 = vmatprep.mubr.f32.mxu1 %v5451_v32 }
 0x102   : > { %4087 = vmatmul.mubr.f32.vlgmr.msra.gmra.mrb[0].mxu0 %v5462_v0 }
 0x103   : > { %4279 = vmatmul.mubr.f32.vlgmr.msra.gmra.mrb[0].mxu1 %v5466_v27  ;;  %4089 = vmatprep.mubr.f32.mxu0 %v5468_v57 }
 0x104   : > { %4401 = vmatpush3.bf16.msk.msra.mxu1 %vm4951_vm6, %v5941_v25  ;;  %4281 = vmatprep.mubr.f32.mxu1 %v5480_v53 }
 0x105   : > { %4353 = vmatpush3.bf16.msk.msra.mxu0 %vm4951_vm6, %v5941_v25 }
 0x106   : > { %4090 = vmatmul.mubr.f32.gmra.mrb[2].mxu0 %v5511_v40 }
 0x107   : > { %4282 = vmatmul.mubr.f32.gmra.mrb[2].mxu1 %v5513_v9  ;;  %4092 = vmatprep.mubr.f32.mxu0 %v5520_v3 }
 0x108   : > { %4284 = vmatprep.mubr.f32.mxu1 %v5528_v29 }
 0x10a   : > { %4093 = vmatmul.mubr.f32.gmra.mrb[4].mxu0 %v5553_v14 }
 0x10b   : > { %4285 = vmatmul.mubr.f32.gmra.mrb[4].mxu1 %v5561_v63  ;;  %4095 = vmatprep.mubr.f32.mxu0 %v5563_v12 }
 0x10c   : > { %4287 = vmatprep.mubr.f32.mxu1 %v5571_v8 }
 0x10e   : > { %4096 = vmatmul.mubr.f32.gmra.mrb[6].mxu0 %v5590_v59 }
 0x10f   : > { %4288 = vmatmul.mubr.f32.gmra.mrb[6].mxu1 %v5601_v24  ;;  %4102 = vmatprep.mubr.f32.mxu0 %v5433_v16 }
 0x110   : > { %4294 = vmatprep.mubr.f32.mxu1 %v5451_v32 }
 0x112   : > { %4103 = vmatmul.mubr.f32.vlgmr.msra.gmra.mrb[0].mxu0 %v5462_v0 }
 0x113   : > { %4295 = vmatmul.mubr.f32.vlgmr.msra.gmra.mrb[0].mxu1 %v5466_v27  ;;  %4105 = vmatprep.mubr.f32.mxu0 %v5468_v57 }
 0x114   : > { %4297 = vmatprep.mubr.f32.mxu1 %v5480_v53 }
 0x116   : > { %4106 = vmatmul.mubr.f32.gmra.mrb[2].mxu0 %v5511_v40 }
 0x117   : > { %4298 = vmatmul.mubr.f32.gmra.mrb[2].mxu1 %v5513_v9  ;;  %4108 = vmatprep.mubr.f32.mxu0 %v5520_v3 }
 0x118   : > { %4300 = vmatprep.mubr.f32.mxu1 %v5528_v29 }
 0x11a   : > { %4109 = vmatmul.mubr.f32.gmra.mrb[4].mxu0 %v5553_v14 }
 0x11b   : > { %4301 = vmatmul.mubr.f32.gmra.mrb[4].mxu1 %v5561_v63  ;;  %4111 = vmatprep.mubr.f32.mxu0 %v5563_v12 }
 0x11c   : > { %4303 = vmatprep.mubr.f32.mxu1 %v5571_v8 }
 0x11e   : > { %4112 = vmatmul.mubr.f32.gmra.mrb[6].mxu0 %v5590_v59 }
 0x11f   : > { %4304 = vmatmul.mubr.f32.gmra.mrb[6].mxu1 %v5601_v24 }
 0x1e5   : > { %v4104_v25 = vpop.f32.mrb[0].mxu0 }
 0x1e6   : > { %3472 = vst.msk [vmem:[%s5790_s26 + $0x8] sm:$0xff] %vm3470_vm7, %v4104_v25  ;;  %v4296_v10 = vpop.f32.mrb[0].mxu1  ;;  %v1856_v16 = vpop.f32.mrb[1].mxu0 }
 0x1e7   : > { %3489 = vrot.lane.b32.xlu0 %v4296_v10, %s4725_s27  ;;  %3471 = vst.msk [vmem:[%s5790_s26] sm:$0xff] %vm3470_vm7, %v1856_v16  ;;  %v3424_v32 = vpop.f32.mrb[1].mxu1 }
 0x1e9   : > { %v4107_v0 = vpop.f32.mrb[2].mxu0 }
 0x1ea   : > { %3474 = vst.msk [vmem:[%s5790_s26 + $0x18] sm:$0xff] %vm3470_vm7, %v4107_v0  ;;  %v4299_v27 = vpop.f32.mrb[2].mxu1  ;;  %v1868_v57 = vpop.f32.mrb[3].mxu0 }
 0x1eb   : > { %3487 = vrot.lane.b32.xlu0 %v3424_v32, %s4725_s27  ;;  %3493 = vrot.lane.b32.xlu1 %v4299_v27, %s4725_s27  ;;  %3473 = vst.msk [vmem:[%s5790_s26 + $0x10] sm:$0xff] %vm3470_vm7, %v1868_v57  ;;  %v3436_v20 = vpop.f32.mrb[3].mxu1 }
 0x1ed   : > { %v4110_v53 = vpop.f32.mrb[4].mxu0 }
 0x1ee   : > { %3476 = vst.msk [vmem:[%s5790_s26 + $0x28] sm:$0xff] %vm3470_vm7, %v4110_v53  ;;  %v4302_v52 = vpop.f32.mrb[4].mxu1  ;;  %v1880_v38 = vpop.f32.mrb[5].mxu0 }
 0x1ef   : > { %3491 = vrot.lane.b32.xlu1 %v3436_v20, %s4725_s27  ;;  %3475 = vst.msk [vmem:[%s5790_s26 + $0x20] sm:$0xff] %vm3470_vm7, %v1880_v38  ;;  %v3448_v43 = vpop.f32.mrb[5].mxu1 }
 0x1f0   : > { %3495 = vrot.lane.b32.xlu0 %v3448_v43, %s4725_s27 }
 0x1f1   : > { %v4113_v22 = vpop.f32.mrb[6].mxu0 }
 0x1f2   : > { %3478 = vst.msk [vmem:[%s5790_s26 + $0x38] sm:$0xff] %vm3470_vm7, %v4113_v22  ;;  %v4305_v40 = vpop.f32.mrb[6].mxu1  ;;  %v1892_v9 = vpop.f32.mrb[7].mxu0 }
 0x1f3   : > { %3497 = vrot.lane.b32.xlu1 %v4302_v52, %s4725_s27  ;;  %3477 = vst.msk [vmem:[%s5790_s26 + $0x30] sm:$0xff] %vm3470_vm7, %v1892_v9  ;;  %v3460_v44 = vpop.f32.mrb[7].mxu1 }
 0x1f4   : > { %3499 = vrot.lane.b32.xlu0 %v3460_v44, %s4725_s27 }
 0x1f7   : > { %3501 = vrot.lane.b32.xlu1 %v4305_v40, %s4725_s27 }
 0x259   : > { %v3490_v3 = vpop.permute.xlu0 %3489 }
 0x25a   : > { %3513 = vst.msk [vmem:[%s5790_s26 + $0x8] sm:$0xff] %vm3511_vm8, %v3490_v3 }
 0x25d   : > { %v3488_v29 = vpop.permute.xlu0 %3487  ;;  %v3494_v6 = vpop.permute.xlu1 %3493 }
 0x25e   : > { %3512 = vst.msk [vmem:[%s5790_s26] sm:$0xff] %vm3511_vm8, %v3488_v29  ;;  %3515 = vst.msk [vmem:[%s5790_s26 + $0x18] sm:$0xff] %vm3511_vm8, %v3494_v6 }
 0x261   : > { %v3492_v49 = vpop.permute.xlu1 %3491 }
 0x262   : > { %3514 = vst.msk [vmem:[%s5790_s26 + $0x10] sm:$0xff] %vm3511_vm8, %v3492_v49  ;;  %v3496_v19 = vpop.permute.xlu0 %3495 }
 0x263   : > { %3516 = vst.msk [vmem:[%s5790_s26 + $0x20] sm:$0xff] %vm3511_vm8, %v3496_v19 }
 0x265   : > { %v3498_v58 = vpop.permute.xlu1 %3497 }
 0x266   : > { %3517 = vst.msk [vmem:[%s5790_s26 + $0x28] sm:$0xff] %vm3511_vm8, %v3498_v58  ;;  %v3500_v50 = vpop.permute.xlu0 %3499 }
 0x267   : > { %3518 = vst.msk [vmem:[%s5790_s26 + $0x30] sm:$0xff] %vm3511_vm8, %v3500_v50 }
 0x269   : > { %v3502_v14 = vpop.permute.xlu1 %3501 }
 0x26a   : > { %3519 = vst.msk [vmem:[%s5790_s26 + $0x38] sm:$0xff] %vm3511_vm8, %v3502_v14 }
 0x26b PF: > { %s14_s11 = sadd.s32 1, %s4718_s11   ;;  %s5995_s6 = smov %s4702_s7 }
 0x26c   : > { %p11_p9 = scmp.ge.s32.totalorder %s14_s11, 4   ;;  %s5996_s7 = smov %s4706_s8 }
 0x26d   : > { %s5997_s8 = smov %s4785_s18  ;;  %s5998_s9 = smov %s4714_s10 }
 0x26e   : > { %s5999_s10 = smov %s6001_s13  ;;  %13 = sbr.rel (!%p11_p9) target bundleno = 4 (0x4), region = 67 }
 0x275   :  { %3550 = vsyncpa [#allocation3], 1 }
 0x276   :  { %3552 = vsyncpa [#allocation3 + $0x1], 1 }

</bundles_post_ra>
